<compile_context>
chip_gen: v5e
topology: v5e:2x2
jax: 0.10.0
libtpu: 0.0.40
codegen_flags: <defaults>
</compile_context>

<pallas_src>
import jax
import jax.numpy as jnp
from jax.experimental import pallas as pl
from jax.experimental.pallas import tpu as pltpu

_MAX_UNROLL = 64  # cap on static per-step batch unroll inside the kernel


def _fc_kernel(x_ref, w_ref, b_ref, o_ref):
    # x_ref: (Bb, 64, Tc)  w_ref: (3, 64)  b_ref: (3, 1) f32  o_ref: (Bb, 3, Tc)
    w = w_ref[...]
    b = b_ref[...]
    for i in range(x_ref.shape[0]):  # static unroll over the batch block
        acc = jnp.dot(w, x_ref[i], preferred_element_type=jnp.float32)
        o_ref[i] = (acc + b).astype(o_ref.dtype)


def _pick_batch_block(B, row_bytes, target_bytes=2 << 20, cap_bytes=8 << 20):
    """Smallest divisor of B whose block reaches ~target_bytes of input per step,
    bounded by the VMEM cap and the unroll cap. Divisor => balanced grid (v7x)."""
    cap_rows = min(B, _MAX_UNROLL, max(1, cap_bytes // max(row_bytes, 1)))
    divs = [d for d in range(1, cap_rows + 1) if B % d == 0]
    for d in divs:
        if d * row_bytes >= target_bytes:
            return d
    return divs[-1]


def fc_pallas(x, weight, bias, *, max_tile_cols=8192):
    """x: (N, M, 64, T, V); weight: (3, 64); bias: (3,) -> out (N, 3, T, V, M)."""
    N, M, C, T, V = x.shape
    assert C == 64, "FC requires 64 input channels"
    O = weight.shape[0]  # 3 output features

    # Pure reshape (no data movement): (N, M, C, T, V) -> (N*M, C, T*V)
    B = N * M
    cols = T * V
    x3d = x.reshape(B, C, cols)
    itemsize = jnp.dtype(x.dtype).itemsize

    # Lane (T*V) tile: block last dim must be a multiple of 128 or the full dim.
    assert max_tile_cols % 128 == 0
    tile_cols = cols if cols <= max_tile_cols else max_tile_cols

    # Batch block so per-step input bytes stay >= ~2 MiB even for small T*V.
    row_bytes = C * tile_cols * itemsize
    Bb = _pick_batch_block(B, row_bytes)

    w = weight.astype(x.dtype)                       # (3, 64) - C on lanes
    b2d = bias.reshape(O, 1).astype(jnp.float32)     # (3, 1) f32 -> f32 accumulator

    grid = (B // Bb, pl.cdiv(cols, tile_cols))

    # Memory-bound hint for XLA scheduling.
    out_bytes = B * O * cols * itemsize
    cost = pl.CostEstimate(
        flops=2 * B * O * C * cols,
        transcendentals=0,
        bytes_accessed=x3d.size * itemsize + out_bytes
        + w.size * itemsize + b2d.size * 4,
    )

    out3d = pl.pallas_call(
        _fc_kernel,
        out_shape=jax.ShapeDtypeStruct((B, O, cols), x.dtype),
        grid_spec=pltpu.PrefetchScalarGridSpec(
            num_scalar_prefetch=0,
            grid=grid,
            in_specs=[
                pl.BlockSpec((Bb, C, tile_cols), lambda b, j: (b, 0, j)),
                pl.BlockSpec((O, C), lambda b, j: (0, 0)),   # resident weight
                pl.BlockSpec((O, 1), lambda b, j: (0, 0)),   # resident bias (f32)
            ],
            out_specs=pl.BlockSpec((Bb, O, tile_cols), lambda b, j: (b, 0, j)),
        ),
        compiler_params=pltpu.CompilerParams(
            dimension_semantics=("parallel", "parallel")),
        cost_estimate=cost,
    )(x3d, w, b2d)

    # Output-side glue only (3 channels) to match the module's layout:
    # (N*M, 3, T*V) -> (N, 3, T, V, M). A consumer that accepts the kernel's
    # lane-dense layout should drop this transpose instead of fusing it here.
    out = out3d.reshape(N, M, O, T, V)
    out = jnp.transpose(out, (0, 2, 3, 4, 1))
    return out


def fc_reference(x, weight, bias):
    N, M, C, T, V = x.shape
    xp = jnp.transpose(x, (0, 1, 3, 4, 2))                 # (N, M, T, V, 64)
    y = jnp.einsum("nmtvc,oc->nmtvo", xp, weight) + bias   # (N, M, T, V, 3)
    return jnp.transpose(y, (0, 4, 2, 3, 1))               # (N, 3, T, V, M)


if __name__ == "__main__":
    key = jax.random.PRNGKey(0)
    kx, kw, kb = jax.random.split(key, 3)

    N, M, C, T, V = 2, 2, 64, 8, 16
    x = jax.random.normal(kx, (N, M, C, T, V), dtype=jnp.float32)

    # deterministic nn.Linear(64, 3)-shaped params
    weight = jax.random.normal(kw, (3, 64), dtype=jnp.float32) * 0.125
    bias = jax.random.normal(kb, (3,), dtype=jnp.float32) * 0.1

    out = jax.block_until_ready(fc_pallas(x, weight, bias))

    ref = fc_reference(x, weight, bias)
    assert out.shape == (N, 3, T, V, M), out.shape
    assert jnp.allclose(out, ref, atol=1e-5, rtol=1e-5)

    print("KERNEL_OK")
</pallas_src>

<mosaic_0001>
module attributes {stable_mosaic.version = 11 : i64} {
  func.func @_fc_kernel(%arg0: i32, %arg1: i32, %arg2: memref<4x64x128xf32, #tpu.memory_space<vmem>>, %arg3: memref<3x64xf32, #tpu.memory_space<vmem>>, %arg4: memref<3x1xf32, #tpu.memory_space<vmem>>, %arg5: memref<4x3x128xf32, #tpu.memory_space<vmem>>) attributes {dimension_semantics = [#tpu.dimension_semantics<parallel>, #tpu.dimension_semantics<parallel>], iteration_bounds = array<i64: 1, 1>, scalar_prefetch = 0 : i64, scratch_operands = 0 : i64, tpu.core_type = #tpu.core_type<tc>, window_params = [{transform_indices = @transform_0, window_bounds = array<i64: 4, 64, 128>}, {pipeline_mode = #tpu.pipeline_mode<synchronous>, transform_indices = @transform_1, window_bounds = array<i64: 3, 64>}, {pipeline_mode = #tpu.pipeline_mode<synchronous>, transform_indices = @transform_2, window_bounds = array<i64: 3, 1>}, {transform_indices = @transform_3, window_bounds = array<i64: 4, 3, 128>}]} {
    %c0 = arith.constant 0 : index
    %c0_0 = arith.constant 0 : index
    %0 = vector.load %arg3[%c0, %c0_0] : memref<3x64xf32, #tpu.memory_space<vmem>>, vector<3x64xf32>
    %c0_1 = arith.constant 0 : index
    %c0_2 = arith.constant 0 : index
    %1 = vector.load %arg4[%c0_1, %c0_2] : memref<3x1xf32, #tpu.memory_space<vmem>>, vector<3x1xf32>
    %c0_3 = arith.constant 0 : index
    %c0_4 = arith.constant 0 : index
    %c0_5 = arith.constant 0 : index
    %2 = vector.load %arg2[%c0_3, %c0_4, %c0_5] : memref<4x64x128xf32, #tpu.memory_space<vmem>>, vector<1x64x128xf32>
    %3 = vector.shape_cast %2 : vector<1x64x128xf32> to vector<64x128xf32>
    %cst = arith.constant dense<0.000000e+00> : vector<3x128xf32>
    %4 = tpu.matmul %0, %3, %cst {dimension_numbers = #tpu.dot_dimension_numbers<[1], [0], [0], [1], [0, 0, 1, 1], [], []>} : vector<3x64xf32>, vector<64x128xf32>, vector<3x128xf32> -> vector<3x128xf32>
    %5 = vector.broadcast %1 : vector<3x1xf32> to vector<3x128xf32>
    %6 = arith.addf %4, %5 : vector<3x128xf32>
    %c0_6 = arith.constant 0 : index
    %c0_7 = arith.constant 0 : index
    %c0_8 = arith.constant 0 : index
    %7 = vector.load %arg5[%c0_6, %c0_7, %c0_8] : memref<4x3x128xf32, #tpu.memory_space<vmem>>, vector<1x3x128xf32>
    %8 = vector.shape_cast %7 : vector<1x3x128xf32> to vector<3x128xf32>
    %9 = vector.shape_cast %6 : vector<3x128xf32> to vector<1x3x128xf32>
    tpu.vector_store %arg5[%c0_6, %c0_7, %c0_8], %9 {strides = array<i32>} : memref<4x3x128xf32, #tpu.memory_space<vmem>>, vector<1x3x128xf32>,
    %c1 = arith.constant 1 : index
    %c0_9 = arith.constant 0 : index
    %c0_10 = arith.constant 0 : index
    %10 = vector.load %arg2[%c1, %c0_9, %c0_10] : memref<4x64x128xf32, #tpu.memory_space<vmem>>, vector<1x64x128xf32>
    %11 = vector.shape_cast %10 : vector<1x64x128xf32> to vector<64x128xf32>
    %cst_11 = arith.constant dense<0.000000e+00> : vector<3x128xf32>
    %12 = tpu.matmul %0, %11, %cst_11 {dimension_numbers = #tpu.dot_dimension_numbers<[1], [0], [0], [1], [0, 0, 1, 1], [], []>} : vector<3x64xf32>, vector<64x128xf32>, vector<3x128xf32> -> vector<3x128xf32>
    %13 = vector.broadcast %1 : vector<3x1xf32> to vector<3x128xf32>
    %14 = arith.addf %12, %13 : vector<3x128xf32>
    %c1_12 = arith.constant 1 : index
    %c0_13 = arith.constant 0 : index
    %c0_14 = arith.constant 0 : index
    %15 = vector.load %arg5[%c1_12, %c0_13, %c0_14] : memref<4x3x128xf32, #tpu.memory_space<vmem>>, vector<1x3x128xf32>
    %16 = vector.shape_cast %15 : vector<1x3x128xf32> to vector<3x128xf32>
    %17 = vector.shape_cast %14 : vector<3x128xf32> to vector<1x3x128xf32>
    tpu.vector_store %arg5[%c1_12, %c0_13, %c0_14], %17 {strides = array<i32>} : memref<4x3x128xf32, #tpu.memory_space<vmem>>, vector<1x3x128xf32>,
    %c2 = arith.constant 2 : index
    %c0_15 = arith.constant 0 : index
    %c0_16 = arith.constant 0 : index
    %18 = vector.load %arg2[%c2, %c0_15, %c0_16] : memref<4x64x128xf32, #tpu.memory_space<vmem>>, vector<1x64x128xf32>
    %19 = vector.shape_cast %18 : vector<1x64x128xf32> to vector<64x128xf32>
    %cst_17 = arith.constant dense<0.000000e+00> : vector<3x128xf32>
    %20 = tpu.matmul %0, %19, %cst_17 {dimension_numbers = #tpu.dot_dimension_numbers<[1], [0], [0], [1], [0, 0, 1, 1], [], []>} : vector<3x64xf32>, vector<64x128xf32>, vector<3x128xf32> -> vector<3x128xf32>
    %21 = vector.broadcast %1 : vector<3x1xf32> to vector<3x128xf32>
    %22 = arith.addf %20, %21 : vector<3x128xf32>
    %c2_18 = arith.constant 2 : index
    %c0_19 = arith.constant 0 : index
    %c0_20 = arith.constant 0 : index
    %23 = vector.load %arg5[%c2_18, %c0_19, %c0_20] : memref<4x3x128xf32, #tpu.memory_space<vmem>>, vector<1x3x128xf32>
    %24 = vector.shape_cast %23 : vector<1x3x128xf32> to vector<3x128xf32>
    %25 = vector.shape_cast %22 : vector<3x128xf32> to vector<1x3x128xf32>
    tpu.vector_store %arg5[%c2_18, %c0_19, %c0_20], %25 {strides = array<i32>} : memref<4x3x128xf32, #tpu.memory_space<vmem>>, vector<1x3x128xf32>,
    %c3 = arith.constant 3 : index
    %c0_21 = arith.constant 0 : index
    %c0_22 = arith.constant 0 : index
    %26 = vector.load %arg2[%c3, %c0_21, %c0_22] : memref<4x64x128xf32, #tpu.memory_space<vmem>>, vector<1x64x128xf32>
    %27 = vector.shape_cast %26 : vector<1x64x128xf32> to vector<64x128xf32>
    %cst_23 = arith.constant dense<0.000000e+00> : vector<3x128xf32>
    %28 = tpu.matmul %0, %27, %cst_23 {dimension_numbers = #tpu.dot_dimension_numbers<[1], [0], [0], [1], [0, 0, 1, 1], [], []>} : vector<3x64xf32>, vector<64x128xf32>, vector<3x128xf32> -> vector<3x128xf32>
    %29 = vector.broadcast %1 : vector<3x1xf32> to vector<3x128xf32>
    %30 = arith.addf %28, %29 : vector<3x128xf32>
    %c3_24 = arith.constant 3 : index
    %c0_25 = arith.constant 0 : index
    %c0_26 = arith.constant 0 : index
    %31 = vector.load %arg5[%c3_24, %c0_25, %c0_26] : memref<4x3x128xf32, #tpu.memory_space<vmem>>, vector<1x3x128xf32>
    %32 = vector.shape_cast %31 : vector<1x3x128xf32> to vector<3x128xf32>
    %33 = vector.shape_cast %30 : vector<3x128xf32> to vector<1x3x128xf32>
    tpu.vector_store %arg5[%c3_24, %c0_25, %c0_26], %33 {strides = array<i32>} : memref<4x3x128xf32, #tpu.memory_space<vmem>>, vector<1x3x128xf32>,
    return
  }
  func.func @transform_0(%arg0: i32, %arg1: i32) -> (i32, i32, i32) {
    %c0_i32 = arith.constant 0 : i32
    %c0_i32_0 = arith.constant 0 : i32
    return %arg0, %c0_i32, %arg1 : i32, i32, i32
  }
  func.func @transform_1(%arg0: i32, %arg1: i32) -> (i32, i32) {
    %c0_i32 = arith.constant 0 : i32
    %c0_i32_0 = arith.constant 0 : i32
    %c0_i32_1 = arith.constant 0 : i32
    return %c0_i32, %c0_i32_0 : i32, i32
  }
  func.func @transform_2(%arg0: i32, %arg1: i32) -> (i32, i32) {
    %c0_i32 = arith.constant 0 : i32
    %c0_i32_0 = arith.constant 0 : i32
    %c0_i32_1 = arith.constant 0 : i32
    return %c0_i32, %c0_i32_0 : i32, i32
  }
  func.func @transform_3(%arg0: i32, %arg1: i32) -> (i32, i32, i32) {
    %c0_i32 = arith.constant 0 : i32
    %c0_i32_0 = arith.constant 0 : i32
    return %arg0, %c0_i32, %arg1 : i32, i32, i32
  }
}

</mosaic_0001>

<bundles_post_ra>
// kernel: tpu_custom_call.1
= control target key start
LH: loop header
LB: loop body
LE: loop exit
PB: predicated region body
PF: predicated region fallthrough
CT: control target
= control target key end

     0   :  { %8 = vsyncpa [#allocation3], 0  ;;  %s206_s15 = smov [#allocation2]   ;;  %s207_s17 = smov 128   ;;  %s255_s0 = inlined_call_operand.hbm [shape: f32[4,64,128], index: 0, kind: input, shape index: {}]   ;;  %s256_s1 = inlined_call_operand.vmem [shape: f32[3,64], index: 1, kind: input, shape index: {}]   ;;  %s257_s2 = inlined_call_operand.vmem [shape: f32[3,1], index: 2, kind: input, shape index: {}]   ;;  %s258_s3 = inlined_call_operand.vmem [shape: f32[4,3,128], index: 3, kind: output, shape index: {}]  }
   0x1   :  { %s13_s14 = sshll.u32 %s255_s0, 4  ;;  %s15_s16 = sshll.u32 %s206_s15, 4  ;;  %s14_s14 = int_to_ptr.hbm [resolvable:$true] %s13_s14  ;;  %s16_s16 = int_to_ptr.vmem [resolvable:$true] %s15_s16 }
   0x2   :  { %s208_s18 = smov 8  }
   0x3   :  { %21 = dma.hbm_to_vmem [thread:$0]  %s14_s14, 4096, %s16_s16, [#allocation3], %s207_s17, %s207_s17, %s208_s18  }
   0x4   :  { %204 = dma.done.wait [#allocation3], 4096  }
   0x5   :  { %205 = vsyncadd [#allocation3], 4294963200  ;;  %v209_v0 = vmov 0   ;;  %v109_v1 = vld [vmem:[#allocation2 + $0xb8] sm:$0xff]  ;;  %v108_v3 = vld [vmem:[#allocation2 + $0xb0] sm:$0xff]  ;;  %vm45_vm0 = vcmask 523264  }
   0x6   :  { %179 = vset.pattern.permute.xlu0 %v209_v0  ;;  %v140_v2 = vld [vmem:[#allocation2 + $0xf8] sm:$0xff]  ;;  %118 = vmatpush.msra.mxu2 %v109_v1  ;;  %v139_v4 = vld [vmem:[#allocation2 + $0xf0] sm:$0xff]  ;;  %v107_v5 = vld [vmem:[#allocation2 + $0xa8] sm:$0xff] }
   0x7   :  { %149 = vmatpush.msra.mxu3 %v140_v2  ;;  %v138_v6 = vld [vmem:[#allocation2 + $0xe8] sm:$0xff]  ;;  %v39_v7 = vld [vmem:[#allocation2 + $0x38] sm:$0xff]  ;;  %v38_v9 = vld [vmem:[#allocation2 + $0x30] sm:$0xff] }
   0x8   :  { %v78_v8 = vld [vmem:[#allocation2 + $0x78] sm:$0xff]  ;;  %119 = vmatpush.msra.mxu2 %v108_v3  ;;  %v77_v10 = vld [vmem:[#allocation2 + $0x70] sm:$0xff]  ;;  %57 = vmatpush.msra.mxu0 %v39_v7  ;;  %v106_v11 = vld [vmem:[#allocation2 + $0xa0] sm:$0xff] }
   0x9   :  { %150 = vmatpush.msra.mxu3 %v139_v4  ;;  %87 = vmatpush.msra.mxu1 %v78_v8  ;;  %v137_v12 = vld [vmem:[#allocation2 + $0xe0] sm:$0xff]  ;;  %v37_v13 = vld [vmem:[#allocation2 + $0x28] sm:$0xff]  ;;  %v105_v15 = vld [vmem:[#allocation2 + $0x98] sm:$0xff] }
   0xa   :  { %120 = vmatpush.msra.mxu2 %v107_v5  ;;  %v76_v14 = vld [vmem:[#allocation2 + $0x68] sm:$0xff]  ;;  %58 = vmatpush.msra.mxu0 %v38_v9  ;;  %v136_v16 = vld [vmem:[#allocation2 + $0xd8] sm:$0xff]  ;;  %v36_v17 = vld [vmem:[#allocation2 + $0x20] sm:$0xff] }
   0xb   :  { %151 = vmatpush.msra.mxu3 %v138_v6  ;;  %88 = vmatpush.msra.mxu1 %v77_v10  ;;  %v75_v18 = vld [vmem:[#allocation2 + $0x60] sm:$0xff]  ;;  %v104_v19 = vld [vmem:[#allocation2 + $0x90] sm:$0xff]  ;;  %v35_v21 = vld [vmem:[#allocation2 + $0x18] sm:$0xff] }
   0xc   :  { %121 = vmatpush.msra.mxu2 %v106_v11  ;;  %59 = vmatpush.msra.mxu0 %v37_v13  ;;  %v135_v20 = vld [vmem:[#allocation2 + $0xd0] sm:$0xff]  ;;  %v74_v22 = vld [vmem:[#allocation2 + $0x58] sm:$0xff]  ;;  %v103_v23 = vld [vmem:[#allocation2 + $0x88] sm:$0xff] }
   0xd   :  { %152 = vmatpush.msra.mxu3 %v137_v12  ;;  %89 = vmatpush.msra.mxu1 %v76_v14  ;;  %v134_v24 = vld [vmem:[#allocation2 + $0xc8] sm:$0xff]  ;;  %v34_v25 = vld [vmem:[#allocation2 + $0x10] sm:$0xff]  ;;  %v102_v27 = vld [vmem:[#allocation2 + $0x80] sm:$0xff] }
   0xe   :  { %122 = vmatpush.msra.mxu2 %v105_v15  ;;  %60 = vmatpush.msra.mxu0 %v36_v17  ;;  %v73_v26 = vld [vmem:[#allocation2 + $0x50] sm:$0xff]  ;;  %v133_v28 = vld [vmem:[#allocation2 + $0xc0] sm:$0xff]  ;;  %v33_v30 = vld [vmem:[#allocation2 + $0x8] sm:$0xff] }
   0xf   :  { %153 = vmatpush.msra.mxu3 %v136_v16  ;;  %90 = vmatpush.msra.mxu1 %v75_v18  ;;  %v30_v29 = vld [vmem:[%s256_s1] sm:$0x7]  ;;  %v72_v31 = vld [vmem:[#allocation2 + $0x48] sm:$0xff] }
  0x10   :  { %123 = vmatpush.msra.mxu2 %v104_v19  ;;  %61 = vmatpush.msra.mxu0 %v35_v21  ;;  %v31_v32 = vld [vmem:[%s257_s2] sm:$0x7] }
  0x11   :  { %154 = vmatpush.msra.mxu3 %v135_v20  ;;  %91 = vmatpush.msra.mxu1 %v74_v22  ;;  %v32_v33 = vld [vmem:[#allocation2] sm:$0xff] }
  0x12   :  { %124 = vmatpush.msra.mxu2 %v103_v23  ;;  %62 = vmatpush.msra.mxu0 %v34_v25  ;;  %v71_v34 = vld [vmem:[#allocation2 + $0x40] sm:$0xff] }
  0x13   :  { %155 = vmatpush.msra.mxu3 %v134_v24  ;;  %92 = vmatpush.msra.mxu1 %v73_v26 }
  0x14   :  { %125 = vmatpush.msra.mxu2 %v102_v27  ;;  %63 = vmatpush.msra.mxu0 %v33_v30 }
  0x15   :  { %156 = vmatpush.msra.mxu3 %v133_v28  ;;  %171 = vmatmul.msk.f32.vlgmr.msra.gmra.mxu2 %vm45_vm0, %v30_v29 }
  0x16   :  { %173 = vmatmul.msk.f32.vlgmr.msra.gmra.mxu3 %vm45_vm0, %v30_v29  ;;  %93 = vmatpush.msra.mxu1 %v72_v31 }
  0x17   :  { %42 = vperm.xlu0 %179, %v31_v32   ;;  %64 = vmatpush.msra.mxu0 %v32_v33 }
  0x18   :  { %94 = vmatpush.msra.mxu1 %v71_v34  ;;  %168 = vmatmul.msk.f32.vlgmr.msra.gmra.mxu0 %vm45_vm0, %v30_v29 }
  0x19   :  { %169 = vmatmul.msk.f32.vlgmr.msra.gmra.mxu1 %vm45_vm0, %v30_v29 }
  0x89   :  { %v43_v35 = vpop.permute.xlu0 %42 }
  0x95   :  { %v66_v36 = vpop.f32.mrf.mxu0 }
  0x96   :  { %v96_v37 = vpop.f32.mrf.mxu1  ;;  %v67_v38 = vadd.f32 %v66_v36, %v43_v35 }
  0x97   :  { %v97_v39 = vadd.f32 %v96_v37, %v43_v35 }
  0x98   :  { %v127_v40 = vpop.f32.mrf.mxu2  ;;  %69 = vst [vmem:[%s258_s3] sm:$0x7] %v67_v38 }
  0x99   :  { %v158_v41 = vpop.f32.mrf.mxu3  ;;  %v128_v42 = vadd.f32 %v127_v40, %v43_v35  ;;  %170 = vst [vmem:[%s258_s3 + $0x4] sm:$0x7] %v97_v39 }
  0x9a   :  { %v159_v43 = vadd.f32 %v158_v41, %v43_v35 }
  0x9b   :  { %172 = vst [vmem:[%s258_s3 + $0x8] sm:$0x7] %v128_v42 }
  0x9c   :  { %174 = vst [vmem:[%s258_s3 + $0xc] sm:$0x7] %v159_v43 }
  0x9d   :  { %167 = vsyncpa [#allocation3], 1 }

</bundles_post_ra>
